<compile_context>
chip_gen: v7x
topology: tpu7x:2x2x1
jax: 0.10.0
libtpu: 0.0.40
codegen_flags: <defaults>
</compile_context>

<pallas_src>
import functools

import jax
import jax.numpy as jnp
from jax.experimental import pallas as pl
from jax.experimental.pallas import tpu as pltpu


def _focal_loss_kernel(logits_ref, targets_ref, alpha_ref, out_ref, *,
                       gamma, n_valid, tile_n):
    i = pl.program_id(0)

    x = logits_ref[...].astype(jnp.float32)      # (TILE_N, C) - cast after load
    t = targets_ref[...]                         # (TILE_N, 1) int32
    a = alpha_ref[...].astype(jnp.float32)       # (1, C)

    # Numerically stable logsumexp along the class (lane) axis, in f32.
    m = jnp.max(x, axis=-1, keepdims=True)                              # (TILE_N, 1)
    lse = jnp.log(jnp.sum(jnp.exp(x - m), axis=-1, keepdims=True)) + m  # (TILE_N, 1)

    # Fused masked gathers of x[y] and alpha[y] (no full logp / float one-hot).
    class_ids = jax.lax.broadcasted_iota(jnp.int32, x.shape, 1)         # (TILE_N, C)
    sel = class_ids == t                                                # (TILE_N, C)
    x_t = jnp.sum(jnp.where(sel, x, 0.0), axis=-1, keepdims=True)       # (TILE_N, 1)
    a_t = jnp.sum(jnp.where(sel, a, 0.0), axis=-1, keepdims=True)       # (TILE_N, 1)

    ce = a_t * (lse - x_t)                       # = -alpha[y] * log_softmax(x)[y]
    pt = jnp.exp(-ce)
    one_m_pt = 1.0 - pt
    if gamma == 2.0:
        mod = one_m_pt * one_m_pt                # VALU multiply; keeps EUP free
    elif gamma == 1.0:
        mod = one_m_pt
    elif gamma == 0.0:
        mod = jnp.ones_like(one_m_pt)
    else:
        mod = one_m_pt ** gamma                  # only on the (TILE_N, 1) column
    fl = mod * ce                                # (TILE_N, 1)

    # Mask rows past the true N (ragged last tile) so the mean stays exact.
    row_ids = i * tile_n + jax.lax.broadcasted_iota(jnp.int32, fl.shape, 0)
    fl = jnp.where(row_ids < n_valid, fl, 0.0)

    # Per-tile partial sum, written lane-dense to this tile's private slot.
    out_ref[...] = jnp.broadcast_to(jnp.sum(fl), (1, 1, 128))


def focal_loss(logits, targets, alpha, gamma=2.0, *, tile_n=512):
    """logits: (N, C), targets: (N,) int, alpha: (C,) -> scalar f32 (mean focal loss)."""
    n, c = logits.shape
    targets2d = targets.reshape(n, 1).astype(jnp.int32)
    alpha2d = alpha.reshape(1, c).astype(jnp.float32)

    # Sublane granularity: 16 rows for sub-32-bit logits, 8 for f32.
    sub = 16 if jnp.dtype(logits.dtype).itemsize < 4 else 8
    if n < sub:
        tile = n                                   # block == full array dim
    else:
        tile = min(tile_n, (n // sub) * sub)       # multiple of `sub`, <= N
    num_tiles = pl.cdiv(n, tile)

    kernel = functools.partial(
        _focal_loss_kernel, gamma=float(gamma), n_valid=n, tile_n=tile)

    itemsize = jnp.dtype(logits.dtype).itemsize
    cost = pl.CostEstimate(
        flops=6 * n * c + 8 * n,
        transcendentals=n * c + 2 * n,
        bytes_accessed=n * c * itemsize + n * 4 + c * 4 + num_tiles * 128 * 4,
    )

    partial_sums = pl.pallas_call(
        kernel,
        out_shape=jax.ShapeDtypeStruct((num_tiles, 1, 128), jnp.float32),
        grid=(num_tiles,),
        in_specs=[
            pl.BlockSpec((tile, c), lambda i: (i, 0)),   # logits tile (pipelined)
            pl.BlockSpec((tile, 1), lambda i: (i, 0)),   # targets tile
            pl.BlockSpec((1, c), lambda i: (0, 0)),      # alpha: resident block
        ],
        out_specs=pl.BlockSpec((1, 1, 128), lambda i: (i, 0, 0)),  # 1 slot / tile
        compiler_params=pltpu.CompilerParams(
            dimension_semantics=("parallel",),           # megacore-shardable (v7x)
            vmem_limit_bytes=32 * 1024 * 1024,
        ),
        cost_estimate=cost,
    )(logits, targets2d, alpha2d)

    # Finish the mean in the wrapper: sum of per-tile partials / true N.
    return jnp.sum(partial_sums[:, 0, 0]) / n


def focal_loss_ref(logits, targets, alpha, gamma=2.0):
    """Pure-JAX reference mirroring the PyTorch module."""
    logp = jax.nn.log_softmax(logits.astype(jnp.float32), axis=-1)
    logp_t = jnp.take_along_axis(logp, targets[:, None], axis=-1)[:, 0]
    ce = -alpha[targets] * logp_t
    pt = jnp.exp(-ce)
    fl = (1.0 - pt) ** gamma * ce
    return jnp.mean(fl)


if __name__ == "__main__":
    # Small shapes consistent with the module: N samples, C classes.
    N, C = 8, 4
    key = jax.random.PRNGKey(0)
    k_logits, k_targets = jax.random.split(key)

    logits = jax.random.normal(k_logits, (N, C), dtype=jnp.float32)
    targets = jax.random.randint(k_targets, (N,), 0, C, dtype=jnp.int32)
    alpha = jnp.linspace(0.25, 1.0, C, dtype=jnp.float32)   # per-class weights
    gamma = 2.0

    out = jax.block_until_ready(focal_loss(logits, targets, alpha, gamma))
    ref = focal_loss_ref(logits, targets, alpha, gamma)
    assert jnp.allclose(out, ref, rtol=1e-5, atol=1e-5), (out, ref)

    # Multi-tile + ragged last-tile path (exercises masking + partial sums).
    N2 = 20
    k2, k3 = jax.random.split(jax.random.PRNGKey(1))
    logits2 = jax.random.normal(k2, (N2, C), dtype=jnp.float32)
    targets2 = jax.random.randint(k3, (N2,), 0, C, dtype=jnp.int32)
    out2 = jax.block_until_ready(focal_loss(logits2, targets2, alpha, gamma))
    ref2 = focal_loss_ref(logits2, targets2, alpha, gamma)
    assert jnp.allclose(out2, ref2, rtol=1e-5, atol=1e-5), (out2, ref2)

    print("KERNEL_OK")
</pallas_src>

<mosaic_0001>
module attributes {stable_mosaic.version = 11 : i64} {
  func.func @_focal_loss_kernel(%arg0: i32, %arg1: memref<8x4xf32, #tpu.memory_space<vmem>>, %arg2: memref<8x1xi32, #tpu.memory_space<vmem>>, %arg3: memref<1x4xf32, #tpu.memory_space<vmem>>, %arg4: memref<1x1x128xf32, #tpu.memory_space<vmem>>) attributes {dimension_semantics = [#tpu.dimension_semantics<parallel>], iteration_bounds = array<i64: 1>, scalar_prefetch = 0 : i64, scratch_operands = 0 : i64, tpu.core_type = #tpu.core_type<tc>, window_params = [{transform_indices = @transform_0, window_bounds = array<i64: 8, 4>}, {transform_indices = @transform_1, window_bounds = array<i64: 8, 1>}, {pipeline_mode = #tpu.pipeline_mode<synchronous>, transform_indices = @transform_2, window_bounds = array<i64: 1, 4>}, {transform_indices = @transform_3, window_bounds = array<i64: 1, 1, 128>}]} {
    %c0 = arith.constant 0 : index
    %c0_0 = arith.constant 0 : index
    %0 = vector.load %arg1[%c0, %c0_0] : memref<8x4xf32, #tpu.memory_space<vmem>>, vector<8x4xf32>
    %c0_1 = arith.constant 0 : index
    %c0_2 = arith.constant 0 : index
    %1 = vector.load %arg2[%c0_1, %c0_2] : memref<8x1xi32, #tpu.memory_space<vmem>>, vector<8x1xi32>
    %c0_3 = arith.constant 0 : index
    %c0_4 = arith.constant 0 : index
    %2 = vector.load %arg3[%c0_3, %c0_4] : memref<1x4xf32, #tpu.memory_space<vmem>>, vector<1x4xf32>
    %cst = arith.constant dense<0xFF800000> : vector<8xf32>
    %3 = vector.multi_reduction <maximumf>, %0, %cst [1] : vector<8x4xf32> to vector<8xf32>
    %4 = vector.shape_cast %3 : vector<8xf32> to vector<8x1xf32>
    %5 = vector.broadcast %4 : vector<8x1xf32> to vector<8x4xf32>
    %6 = arith.subf %0, %5 : vector<8x4xf32>
    %7 = math.exp %6 : vector<8x4xf32>
    %cst_5 = arith.constant dense<0.000000e+00> : vector<8xf32>
    %8 = vector.multi_reduction <add>, %7, %cst_5 [1] : vector<8x4xf32> to vector<8xf32>
    %9 = vector.shape_cast %8 : vector<8xf32> to vector<8x1xf32>
    %10 = math.log %9 : vector<8x1xf32>
    %11 = arith.addf %10, %4 : vector<8x1xf32>
    %12 = tpu.iota {dimensions = array<i32: 1>} : vector<8x4xi32>
    %13 = vector.broadcast %1 : vector<8x1xi32> to vector<8x4xi32>
    %14 = arith.cmpi eq, %12, %13 : vector<8x4xi32>
    %cst_6 = arith.constant 0.000000e+00 : f32
    %15 = vector.broadcast %cst_6 : f32 to vector<8x4xf32>
    %16 = arith.select %14, %0, %15 : vector<8x4xi1>, vector<8x4xf32>
    %cst_7 = arith.constant dense<0.000000e+00> : vector<8xf32>
    %17 = vector.multi_reduction <add>, %16, %cst_7 [1] : vector<8x4xf32> to vector<8xf32>
    %18 = vector.shape_cast %17 : vector<8xf32> to vector<8x1xf32>
    %cst_8 = arith.constant 0.000000e+00 : f32
    %19 = vector.shape_cast %2 : vector<1x4xf32> to vector<1x4xf32>
    %20 = vector.broadcast %19 : vector<1x4xf32> to vector<8x4xf32>
    %21 = vector.broadcast %cst_8 : f32 to vector<8x4xf32>
    %22 = arith.select %14, %20, %21 : vector<8x4xi1>, vector<8x4xf32>
    %cst_9 = arith.constant dense<0.000000e+00> : vector<8xf32>
    %23 = vector.multi_reduction <add>, %22, %cst_9 [1] : vector<8x4xf32> to vector<8xf32>
    %24 = vector.shape_cast %23 : vector<8xf32> to vector<8x1xf32>
    %25 = arith.subf %11, %18 : vector<8x1xf32>
    %26 = arith.mulf %24, %25 : vector<8x1xf32>
    %cst_10 = arith.constant 0.000000e+00 : f32
    %27 = vector.broadcast %cst_10 : f32 to vector<8x1xf32>
    %28 = arith.subf %27, %26 : vector<8x1xf32>
    %29 = math.exp %28 : vector<8x1xf32>
    %cst_11 = arith.constant 1.000000e+00 : f32
    %30 = vector.broadcast %cst_11 : f32 to vector<8x1xf32>
    %31 = arith.subf %30, %29 : vector<8x1xf32>
    %32 = arith.mulf %31, %31 : vector<8x1xf32>
    %33 = arith.mulf %32, %26 : vector<8x1xf32>
    %c8_i32 = arith.constant 8 : i32
    %34 = arith.muli %arg0, %c8_i32 : i32
    %35 = tpu.iota {dimensions = array<i32: 0>} : vector<8x1xi32>
    %36 = vector.broadcast %34 : i32 to vector<8x1xi32>
    %37 = arith.addi %36, %35 : vector<8x1xi32>
    %c8_i32_12 = arith.constant 8 : i32
    %38 = vector.broadcast %c8_i32_12 : i32 to vector<8x1xi32>
    %39 = arith.cmpi slt, %37, %38 : vector<8x1xi32>
    %cst_13 = arith.constant 0.000000e+00 : f32
    %40 = vector.broadcast %cst_13 : f32 to vector<8x1xf32>
    %41 = arith.select %39, %33, %40 : vector<8x1xi1>, vector<8x1xf32>
    %42 = vector.shape_cast %41 : vector<8x1xf32> to vector<1x8x1xf32>
    %cst_14 = arith.constant dense<0.000000e+00> : vector<1xf32>
    %43 = vector.multi_reduction <add>, %42, %cst_14 [1, 2] : vector<1x8x1xf32> to vector<1xf32>
    %44 = vector.shape_cast %43 : vector<1xf32> to vector<1x1x1xf32>
    %45 = vector.extract %44[0, 0, 0] : f32 from vector<1x1x1xf32>
    %46 = vector.broadcast %45 : f32 to vector<1x1x128xf32>
    %c0_15 = arith.constant 0 : index
    %c0_16 = arith.constant 0 : index
    %c0_17 = arith.constant 0 : index
    %47 = vector.load %arg4[%c0_15, %c0_16, %c0_17] : memref<1x1x128xf32, #tpu.memory_space<vmem>>, vector<1x1x128xf32>
    tpu.vector_store %arg4[%c0_15, %c0_16, %c0_17], %46 {strides = array<i32>} : memref<1x1x128xf32, #tpu.memory_space<vmem>>, vector<1x1x128xf32>,
    return
  }
  func.func @transform_0(%arg0: i32) -> (i32, i32) {
    %c0_i32 = arith.constant 0 : i32
    %c0_i32_0 = arith.constant 0 : i32
    return %arg0, %c0_i32 : i32, i32
  }
  func.func @transform_1(%arg0: i32) -> (i32, i32) {
    %c0_i32 = arith.constant 0 : i32
    %c0_i32_0 = arith.constant 0 : i32
    return %arg0, %c0_i32 : i32, i32
  }
  func.func @transform_2(%arg0: i32) -> (i32, i32) {
    %c0_i32 = arith.constant 0 : i32
    %c0_i32_0 = arith.constant 0 : i32
    %c0_i32_1 = arith.constant 0 : i32
    return %c0_i32, %c0_i32_0 : i32, i32
  }
  func.func @transform_3(%arg0: i32) -> (i32, i32, i32) {
    %c0_i32 = arith.constant 0 : i32
    %c0_i32_0 = arith.constant 0 : i32
    %c0_i32_1 = arith.constant 0 : i32
    return %arg0, %c0_i32, %c0_i32_0 : i32, i32, i32
  }
}

</mosaic_0001>

<bundles_post_ra>
// kernel: tpu_custom_call.1
= control target key start
LH: loop header
LB: loop body
LE: loop exit
PB: predicated region body
PF: predicated region fallthrough
CT: control target
= control target key end

     0   :  { %vm18_vm0 = vcmask 31744   ;;  %s176_s0 = inlined_call_operand.vmem [shape: f32[8,4], index: 0, kind: input, shape index: {}]   ;;  %s177_s1 = inlined_call_operand.vmem [shape: s32[8,1], index: 1, kind: input, shape index: {}]   ;;  %s178_s2 = inlined_call_operand.vmem [shape: f32[1,4], index: 2, kind: input, shape index: {}]   ;;  %s179_s3 = inlined_call_operand.hbm [shape: f32[1,1,128], index: 3, kind: output, shape index: {}]  }
   0x1   :  { %v15_v0 = vld [vmem:[%s176_s0] sm:$0xff] }
   0x2   :  { %8 = vsyncpa [#allocation3], 0  ;;  %v19_v1 = vsel %vm18_vm0, %v15_v0, -inf  ;;  %v129_v2 = vmov 0   ;;  %v16_v3 = vld [vmem:[%s177_s1] sm:$0xff]  ;;  %v31_v7 = vlaneseq  ;;  %vm66_vm2 = vcmask 7168  }
   0x3   :  { %98 = vset.pattern.permute.xlu0 %v129_v2  ;;  %v93_v13 = vld [vmem:[%s178_s2] ss:$0 sm:$0xff]  ;;  %s130_s1 = smov [#allocation2]  }
   0x4   :  { %20 = vmax.xlane.f32.xlu0 %v19_v1  ;;  %v32_v8 = vand.u32 127, %v31_v7  ;;  %s85_s2 = sshll.u32 %s130_s1, 4  ;;  %s86_s2 = int_to_ptr.vmem [resolvable:$true] %s85_s2 }
   0x5   :  { %s105_s18 = scalar_lea.vmem %s86_s2, 16  ;;  %s109_s19 = scalar_lea.vmem %s86_s2, 32 }
   0x6   :  { %p106_p0 = scmp.ne.s32.totalorder %s86_s2, %s105_s18  ;;  %p110_p1 = scmp.lt.s32.totalorder %s86_s2, %s86_s2 }
   0x7   :  { %p111_p2 = scmp.lt.s32.totalorder %s109_s19, %s105_s18 }
   0x9   :  { %p112_p3 = por %p111_p2, %p110_p1 }
   0xb   :  { %p113_p4 = pnand %p112_p3, %p106_p0 }
  0x1a   :  { %34 = vperm.xlu0 %98, %v16_v3  }
  0x91   :  { %v21_v4 = vpop.xlane.xlu0 %20 }
  0x92   :  { %v22_v5 = vsub.f32 %v15_v0, %v21_v4 }
  0x94   :  { %v23_v6 = vmul.f32 1.442695, %v22_v5 }
  0x96   :  { %99 = vpow2.f32 %v23_v6 }
  0x99   :  { %v35_v9 = vpop.permute.xlu0 %34 }
  0x9a   :  { %vm36_vm1 = vcmp.eq.s32.totalorder %v32_v8, %v35_v9 }
  0x9b   :  { %v37_v11 = vsel %vm36_vm1, %v15_v0, 0.0  ;;  %v47_v15 = vsel %vm36_vm1, %v93_v13, 0.0 }
  0x9c   :  { %v38_v14 = vsel %vm18_vm0, %v37_v11, 0.0  ;;  %v48_v16 = vsel %vm18_vm0, %v47_v15, 0.0 }
  0xa0   :  { %v100_v10 = vpop.eup %99 }
  0xa1   :  { %v25_v12 = vsel %vm18_vm0, %v100_v10, 0.0 }
  0xa2   :  { %26 = vadd.xlane.f32.xlu1 %v25_v12 }
  0xa6   :  { %39 = vadd.xlane.f32.xlu1 %v38_v14 }
  0xaa   :  { %49 = vadd.xlane.f32.xlu1 %v48_v16 }
 0x12f   :  { %v27_v17 = vpop.xlane.xlu1 %26 }
 0x130   :  { %101 = vlog2.f32 %v27_v17 }
 0x133   :  { %v40_v19 = vpop.xlane.xlu1 %39 }
 0x137   :  { %v50_v23 = vpop.xlane.xlu1 %49 }
 0x13a   :  { %v102_v18 = vpop.eup %101 }
 0x13b   :  { %v29_v20 = vmul.f32 0.6931472, %v102_v18 }
 0x13d   :  { %v30_v21 = vadd.f32 %v29_v20, %v21_v4 }
 0x13f   :  { %v51_v22 = vsub.f32 %v30_v21, %v40_v19 }
 0x141   :  { %v52_v24 = vmul.f32 %v51_v22, %v50_v23 }
 0x143   :  { %v53_v25 = vsub.f32 0.0, %v52_v24 }
 0x145   :  { %v54_v26 = vmul.f32 1.442695, %v53_v25 }
 0x147   :  { %103 = vpow2.f32 %v54_v26 }
 0x151   :  { %v104_v27 = vpop.eup %103 }
 0x152   :  { %v56_v28 = vsub.f32 1.0, %v104_v27 }
 0x154   :  { %v57_v29 = vmul.f32 %v56_v28, %v56_v28 }
 0x156   :  { %v58_v30 = vmul.f32 %v57_v29, %v52_v24 }
 0x158   :  { %v67_v31 = vsel %vm66_vm2, %v58_v30, 0.0 }
 0x159   :  { %68 = vadd.xlane.f32.xlu1 %v67_v31 }
 0x1e6   :  { %v69_v32 = vpop.xlane.xlu1 %68 }
 0x1e7   :  { %v70_v33 = vrot.slane %v69_v32, 4 }
 0x1e9   :  { %v71_v34 = vadd.f32 %v70_v33, %v69_v32 }
 0x1eb   :  { %v72_v35 = vrot.slane %v71_v34, 2 }
 0x1ed   :  { %v73_v36 = vadd.f32 %v72_v35, %v71_v34 }
 0x1ef   :  { %v74_v37 = vrot.slane %v73_v36, 1 }
 0x1f1   :  { %v75_v38 = vadd.f32 %v74_v37, %v73_v36 }
 0x1f3   :  { %94 = vpush %v75_v38 }
 0x224   :  { %s95_s17 = spop %94 }
 0x225   :  { %v77_v39 = vstv %s95_s17 }
 0x226   :  { %78 = vst [vmem:[#allocation2] sm:$0x1] %v77_v39 }
 0x227   :  { %116 = shalt.err (!%p113_p4)
}
 0x228   :  { %s117_s22 = scalar_lea.hbm %s179_s3, 16 }
 0x229   :  { %p118_p5 = scmp.ne.s32.totalorder %s179_s3, %s117_s22  ;;  %p121_p6 = scmp.lt.u32.totalorder %s117_s22, %s179_s3 }
 0x22b   :  { %p123_p7 = pnand %p121_p6, %p118_p5 }
 0x22d   :  { %126 = shalt.err (!%p123_p7)
}
 0x22e   :  { %88 = dma.vmem_to_hbm [thread:$0]  %s86_s2, 16, %s179_s3, [#allocation3]  }
 0x22f   :  { %127 = dma.done.wait [#allocation3], 16  }
 0x230   :  { %128 = vsyncadd [#allocation3], 4294967280 }
 0x231   :  { %92 = vsyncpa [#allocation3], 1 }

</bundles_post_ra>
